<compile_context>
chip_gen: v7x
topology: tpu7x:2x2x1
jax: 0.10.0
libtpu: 0.0.40
codegen_flags: <defaults>
</compile_context>

<pallas_src>
import jax
import jax.numpy as jnp
from jax.experimental import pallas as pl
from jax.experimental.pallas import tpu as pltpu

STATE_DIM = 3      # Pendulum-v1 observation: [cos(theta), sin(theta), theta_dot]
ACTION_DIM = 3     # DISCRETE_ACTIONS = [[-2.0], [0.0], [2.0]]
HIDDEN = 128

SUBLANE = 8
OUT_PAD = 8              # action_dim (3) padded to one sublane group of lanes
MAX_TILE_B = 1024        # batch-tile rows per grid step (large batches)
SINGLE_TILE_MAX = 512    # batches up to this run as a single un-padded tile


def _qnet_kernel(x_ref, w1_ref, b1_ref, w2_ref, b2_ref, w3_ref, b3_ref, o_ref):
    """Fused 3-layer MLP on one batch tile: relu(relu(x@W1+b1)@W2+b2)@W3+b3."""
    x = x_ref[...]                                 # (TB, 3)   f32
    w1 = w1_ref[...]                               # (3, 128)  f32

    # Layer 1 on the VPU (K = 3): three broadcast multiply-adds.  Keeps the tiny
    # reduction off the MXU critical path and needs no K padding of x.
    h1 = (x[:, 0:1] * w1[0:1, :]
          + x[:, 1:2] * w1[1:2, :]
          + x[:, 2:3] * w1[2:3, :]
          + b1_ref[...])                           # (TB, 128) f32
    h1 = jnp.maximum(h1, 0.0)

    # Layers 2 & 3 on the MXU: bf16 operands, f32 accumulation.
    h2 = jnp.dot(h1.astype(jnp.bfloat16), w2_ref[...],
                 preferred_element_type=jnp.float32) + b2_ref[...]
    h2 = jnp.maximum(h2, 0.0)                      # (TB, 128) f32

    out = jnp.dot(h2.astype(jnp.bfloat16), w3_ref[...],
                  preferred_element_type=jnp.float32) + b3_ref[...]
    o_ref[...] = out.astype(o_ref.dtype)           # (TB, 8)


def prepare_params(params):
    """One-time weight prep (outside the hot loop): cast MXU weights to bf16 and
    pad the layer-3 output dim from 3 to 8 lanes."""
    w1, b1, w2, b2, w3, b3 = params
    w1_p = w1.astype(jnp.float32)                                   # (3, 128)   VPU layer
    b1_p = b1.astype(jnp.float32).reshape(1, HIDDEN)                # (1, 128)
    w2_p = w2.astype(jnp.bfloat16)                                  # (128, 128) MXU operand
    b2_p = b2.astype(jnp.float32).reshape(1, HIDDEN)                # (1, 128)
    w3_p = jnp.pad(w3, ((0, 0), (0, OUT_PAD - ACTION_DIM))).astype(jnp.bfloat16)   # (128, 8)
    b3_p = jnp.pad(b3.reshape(1, ACTION_DIM),
                   ((0, 0), (0, OUT_PAD - ACTION_DIM))).astype(jnp.float32)        # (1, 8)
    return (w1_p, b1_p, w2_p, b2_p, w3_p, b3_p)


def _round_up(x, m):
    return ((x + m - 1) // m) * m


def _batch_tiling(B):
    """Returns (Bp, tile_b, grid_b).

    Small batches: one exact tile, no padding (block dims == full array dims).
    Large batches: >= 2 tiles so the 'parallel' grid axis gives both v7x
    TensorCores work; tile capped at MAX_TILE_B to bound per-tile VMEM temps.
    """
    if B <= SINGLE_TILE_MAX:
        return B, B, 1
    Bp8 = _round_up(B, SUBLANE)
    tile_b = min(MAX_TILE_B, _round_up(pl.cdiv(Bp8, 2), SUBLANE))
    Bp = _round_up(Bp8, tile_b)
    return Bp, tile_b, Bp // tile_b


@jax.jit
def qnetwork_forward(x, prepared):
    """x: (B, STATE_DIM) float32, prepared = prepare_params(params) -> (B, ACTION_DIM)."""
    w1_p, b1_p, w2_p, b2_p, w3_p, b3_p = prepared
    B = x.shape[0]
    Bp, tile_b, grid_b = _batch_tiling(B)

    x_in = x.astype(jnp.float32)
    if Bp != B:
        x_in = jnp.pad(x_in, ((0, Bp - B), (0, 0)))    # pad batch rows only

    out_p = pl.pallas_call(
        _qnet_kernel,
        out_shape=jax.ShapeDtypeStruct((Bp, OUT_PAD), jnp.float32),
        grid=(grid_b,),
        in_specs=[
            pl.BlockSpec((tile_b, STATE_DIM), lambda i: (i, 0)),   # x tile (per grid step)
            pl.BlockSpec((STATE_DIM, HIDDEN), lambda i: (0, 0)),   # w1 (VMEM-resident)
            pl.BlockSpec((1, HIDDEN), lambda i: (0, 0)),           # b1
            pl.BlockSpec((HIDDEN, HIDDEN), lambda i: (0, 0)),      # w2 (bf16)
            pl.BlockSpec((1, HIDDEN), lambda i: (0, 0)),           # b2
            pl.BlockSpec((HIDDEN, OUT_PAD), lambda i: (0, 0)),     # w3 (bf16, N padded to 8)
            pl.BlockSpec((1, OUT_PAD), lambda i: (0, 0)),          # b3
        ],
        out_specs=pl.BlockSpec((tile_b, OUT_PAD), lambda i: (i, 0)),
        compiler_params=pltpu.CompilerParams(
            dimension_semantics=("parallel",)),
    )(x_in, w1_p, b1_p, w2_p, b2_p, w3_p, b3_p)

    return out_p[:B, :ACTION_DIM]


def init_params(key):
    """Deterministic init matching nn.Linear default (uniform +-1/sqrt(fan_in))."""
    ks = jax.random.split(key, 6)

    def linear(kw, kb, fan_in, fan_out):
        bound = 1.0 / jnp.sqrt(jnp.float32(fan_in))
        w = jax.random.uniform(kw, (fan_in, fan_out), jnp.float32, -bound, bound)
        b = jax.random.uniform(kb, (fan_out,), jnp.float32, -bound, bound)
        return w, b

    w1, b1 = linear(ks[0], ks[1], STATE_DIM, HIDDEN)
    w2, b2 = linear(ks[2], ks[3], HIDDEN, HIDDEN)
    w3, b3 = linear(ks[4], ks[5], HIDDEN, ACTION_DIM)
    return (w1, b1, w2, b2, w3, b3)


def _ref_forward(x, params):
    w1, b1, w2, b2, w3, b3 = params
    h1 = jnp.maximum(x @ w1 + b1, 0.0)
    h2 = jnp.maximum(h1 @ w2 + b2, 0.0)
    return h2 @ w3 + b3


if __name__ == "__main__":
    key = jax.random.PRNGKey(0)
    k_param, k_x, k_x2 = jax.random.split(key, 3)

    params = init_params(k_param)
    prepared = prepare_params(params)   # one-time weight prep (out of hot loop)

    # Small-batch path (typical action-selection call): single un-padded tile.
    batch = 4
    x = jax.random.normal(k_x, (batch, STATE_DIM), jnp.float32)
    out = qnetwork_forward(x, prepared)
    jax.block_until_ready(out)
    ref = _ref_forward(x, params)
    assert out.shape == (batch, ACTION_DIM), out.shape
    # bf16 MXU operands -> relaxed tolerance vs. the f32 reference.
    assert jnp.allclose(out, ref, atol=5e-2, rtol=5e-2), (out, ref)

    # Larger batch exercising the tiled / pipelined / dual-core grid path.
    big_batch = 1024
    x_big = jax.random.normal(k_x2, (big_batch, STATE_DIM), jnp.float32)
    out_big = qnetwork_forward(x_big, prepared)
    jax.block_until_ready(out_big)
    ref_big = _ref_forward(x_big, params)
    assert out_big.shape == (big_batch, ACTION_DIM), out_big.shape
    assert jnp.allclose(out_big, ref_big, atol=5e-2, rtol=5e-2)

    print("KERNEL_OK")
</pallas_src>

<mosaic_0001>
module attributes {stable_mosaic.version = 11 : i64} {
  func.func @_qnet_kernel(%arg0: i32, %arg1: memref<4x3xf32, #tpu.memory_space<vmem>>, %arg2: memref<3x128xf32, #tpu.memory_space<vmem>>, %arg3: memref<1x128xf32, #tpu.memory_space<vmem>>, %arg4: memref<128x128xbf16, #tpu.memory_space<vmem>>, %arg5: memref<1x128xf32, #tpu.memory_space<vmem>>, %arg6: memref<128x8xbf16, #tpu.memory_space<vmem>>, %arg7: memref<1x8xf32, #tpu.memory_space<vmem>>, %arg8: memref<4x8xf32, #tpu.memory_space<vmem>>) attributes {dimension_semantics = [#tpu.dimension_semantics<parallel>], iteration_bounds = array<i64: 1>, scalar_prefetch = 0 : i64, scratch_operands = 0 : i64, tpu.core_type = #tpu.core_type<tc>, window_params = [{transform_indices = @transform_0, window_bounds = array<i64: 4, 3>}, {pipeline_mode = #tpu.pipeline_mode<synchronous>, transform_indices = @transform_1, window_bounds = array<i64: 3, 128>}, {pipeline_mode = #tpu.pipeline_mode<synchronous>, transform_indices = @transform_2, window_bounds = array<i64: 1, 128>}, {pipeline_mode = #tpu.pipeline_mode<synchronous>, transform_indices = @transform_3, window_bounds = array<i64: 128, 128>}, {pipeline_mode = #tpu.pipeline_mode<synchronous>, transform_indices = @transform_4, window_bounds = array<i64: 1, 128>}, {pipeline_mode = #tpu.pipeline_mode<synchronous>, transform_indices = @transform_5, window_bounds = array<i64: 128, 8>}, {pipeline_mode = #tpu.pipeline_mode<synchronous>, transform_indices = @transform_6, window_bounds = array<i64: 1, 8>}, {transform_indices = @transform_7, window_bounds = array<i64: 4, 8>}]} {
    %c0 = arith.constant 0 : index
    %c0_0 = arith.constant 0 : index
    %0 = vector.load %arg1[%c0, %c0_0] : memref<4x3xf32, #tpu.memory_space<vmem>>, vector<4x3xf32>
    %c0_1 = arith.constant 0 : index
    %c0_2 = arith.constant 0 : index
    %1 = vector.load %arg2[%c0_1, %c0_2] : memref<3x128xf32, #tpu.memory_space<vmem>>, vector<3x128xf32>
    %2 = vector.extract_strided_slice %0 {offsets = [0, 0], sizes = [4, 1], strides = [1, 1]} : vector<4x3xf32> to vector<4x1xf32>
    %3 = vector.extract_strided_slice %1 {offsets = [0, 0], sizes = [1, 128], strides = [1, 1]} : vector<3x128xf32> to vector<1x128xf32>
    %4 = vector.broadcast %2 : vector<4x1xf32> to vector<4x128xf32>
    %5 = vector.broadcast %3 : vector<1x128xf32> to vector<4x128xf32>
    %6 = arith.mulf %4, %5 : vector<4x128xf32>
    %7 = vector.extract_strided_slice %0 {offsets = [0, 1], sizes = [4, 1], strides = [1, 1]} : vector<4x3xf32> to vector<4x1xf32>
    %8 = vector.extract_strided_slice %1 {offsets = [1, 0], sizes = [1, 128], strides = [1, 1]} : vector<3x128xf32> to vector<1x128xf32>
    %9 = vector.broadcast %7 : vector<4x1xf32> to vector<4x128xf32>
    %10 = vector.broadcast %8 : vector<1x128xf32> to vector<4x128xf32>
    %11 = arith.mulf %9, %10 : vector<4x128xf32>
    %12 = arith.addf %6, %11 : vector<4x128xf32>
    %13 = vector.extract_strided_slice %0 {offsets = [0, 2], sizes = [4, 1], strides = [1, 1]} : vector<4x3xf32> to vector<4x1xf32>
    %14 = vector.extract_strided_slice %1 {offsets = [2, 0], sizes = [1, 128], strides = [1, 1]} : vector<3x128xf32> to vector<1x128xf32>
    %15 = vector.broadcast %13 : vector<4x1xf32> to vector<4x128xf32>
    %16 = vector.broadcast %14 : vector<1x128xf32> to vector<4x128xf32>
    %17 = arith.mulf %15, %16 : vector<4x128xf32>
    %18 = arith.addf %12, %17 : vector<4x128xf32>
    %c0_3 = arith.constant 0 : index
    %c0_4 = arith.constant 0 : index
    %19 = vector.load %arg3[%c0_3, %c0_4] : memref<1x128xf32, #tpu.memory_space<vmem>>, vector<1x128xf32>
    %20 = vector.broadcast %19 : vector<1x128xf32> to vector<4x128xf32>
    %21 = arith.addf %18, %20 : vector<4x128xf32>
    %cst = arith.constant 0.000000e+00 : f32
    %22 = vector.broadcast %cst : f32 to vector<4x128xf32>
    %23 = arith.maximumf %21, %22 : vector<4x128xf32>
    %24 = arith.truncf %23 : vector<4x128xf32> to vector<4x128xbf16>
    %c0_5 = arith.constant 0 : index
    %c0_6 = arith.constant 0 : index
    %25 = vector.load %arg4[%c0_5, %c0_6] : memref<128x128xbf16, #tpu.memory_space<vmem>>, vector<128x128xbf16>
    %cst_7 = arith.constant dense<0.000000e+00> : vector<4x128xf32>
    %26 = tpu.matmul %24, %25, %cst_7 {dimension_numbers = #tpu.dot_dimension_numbers<[1], [0], [0], [1], [0, 0, 1, 1], [], []>} : vector<4x128xbf16>, vector<128x128xbf16>, vector<4x128xf32> -> vector<4x128xf32>
    %c0_8 = arith.constant 0 : index
    %c0_9 = arith.constant 0 : index
    %27 = vector.load %arg5[%c0_8, %c0_9] : memref<1x128xf32, #tpu.memory_space<vmem>>, vector<1x128xf32>
    %28 = vector.broadcast %27 : vector<1x128xf32> to vector<4x128xf32>
    %29 = arith.addf %26, %28 : vector<4x128xf32>
    %cst_10 = arith.constant 0.000000e+00 : f32
    %30 = vector.broadcast %cst_10 : f32 to vector<4x128xf32>
    %31 = arith.maximumf %29, %30 : vector<4x128xf32>
    %32 = arith.truncf %31 : vector<4x128xf32> to vector<4x128xbf16>
    %c0_11 = arith.constant 0 : index
    %c0_12 = arith.constant 0 : index
    %33 = vector.load %arg6[%c0_11, %c0_12] : memref<128x8xbf16, #tpu.memory_space<vmem>>, vector<128x8xbf16>
    %cst_13 = arith.constant dense<0.000000e+00> : vector<4x8xf32>
    %34 = tpu.matmul %32, %33, %cst_13 {dimension_numbers = #tpu.dot_dimension_numbers<[1], [0], [0], [1], [0, 0, 1, 1], [], []>} : vector<4x128xbf16>, vector<128x8xbf16>, vector<4x8xf32> -> vector<4x8xf32>
    %c0_14 = arith.constant 0 : index
    %c0_15 = arith.constant 0 : index
    %35 = vector.load %arg7[%c0_14, %c0_15] : memref<1x8xf32, #tpu.memory_space<vmem>>, vector<1x8xf32>
    %36 = vector.broadcast %35 : vector<1x8xf32> to vector<4x8xf32>
    %37 = arith.addf %34, %36 : vector<4x8xf32>
    %c0_16 = arith.constant 0 : index
    %c0_17 = arith.constant 0 : index
    %38 = vector.load %arg8[%c0_16, %c0_17] : memref<4x8xf32, #tpu.memory_space<vmem>>, vector<4x8xf32>
    tpu.vector_store %arg8[%c0_16, %c0_17], %37 {strides = array<i32>} : memref<4x8xf32, #tpu.memory_space<vmem>>, vector<4x8xf32>,
    return
  }
  func.func @transform_0(%arg0: i32) -> (i32, i32) {
    %c0_i32 = arith.constant 0 : i32
    %c0_i32_0 = arith.constant 0 : i32
    return %arg0, %c0_i32 : i32, i32
  }
  func.func @transform_1(%arg0: i32) -> (i32, i32) {
    %c0_i32 = arith.constant 0 : i32
    %c0_i32_0 = arith.constant 0 : i32
    %c0_i32_1 = arith.constant 0 : i32
    return %c0_i32, %c0_i32_0 : i32, i32
  }
  func.func @transform_2(%arg0: i32) -> (i32, i32) {
    %c0_i32 = arith.constant 0 : i32
    %c0_i32_0 = arith.constant 0 : i32
    %c0_i32_1 = arith.constant 0 : i32
    return %c0_i32, %c0_i32_0 : i32, i32
  }
  func.func @transform_3(%arg0: i32) -> (i32, i32) {
    %c0_i32 = arith.constant 0 : i32
    %c0_i32_0 = arith.constant 0 : i32
    %c0_i32_1 = arith.constant 0 : i32
    return %c0_i32, %c0_i32_0 : i32, i32
  }
  func.func @transform_4(%arg0: i32) -> (i32, i32) {
    %c0_i32 = arith.constant 0 : i32
    %c0_i32_0 = arith.constant 0 : i32
    %c0_i32_1 = arith.constant 0 : i32
    return %c0_i32, %c0_i32_0 : i32, i32
  }
  func.func @transform_5(%arg0: i32) -> (i32, i32) {
    %c0_i32 = arith.constant 0 : i32
    %c0_i32_0 = arith.constant 0 : i32
    %c0_i32_1 = arith.constant 0 : i32
    return %c0_i32, %c0_i32_0 : i32, i32
  }
  func.func @transform_6(%arg0: i32) -> (i32, i32) {
    %c0_i32 = arith.constant 0 : i32
    %c0_i32_0 = arith.constant 0 : i32
    %c0_i32_1 = arith.constant 0 : i32
    return %c0_i32, %c0_i32_0 : i32, i32
  }
  func.func @transform_7(%arg0: i32) -> (i32, i32) {
    %c0_i32 = arith.constant 0 : i32
    %c0_i32_0 = arith.constant 0 : i32
    return %arg0, %c0_i32 : i32, i32
  }
}

</mosaic_0001>

<bundles_post_ra>
// kernel: qnetwork_forward.1
= control target key start
LH: loop header
LB: loop body
LE: loop exit
PB: predicated region body
PF: predicated region fallthrough
CT: control target
= control target key end

     0   :  { %v437_v1 = vmov 0   ;;  %v438_v2 = vmov 2   ;;  %v439_v4 = vmov 0.0   ;;  %v440_v6 = vmov 1   ;;  %s576_s0 = inlined_call_operand.vmem [shape: f32[4,3], index: 0, kind: input, shape index: {}]   ;;  %s577_s1 = inlined_call_operand.vmem [shape: f32[3,128], index: 1, kind: input, shape index: {}]   ;;  %s578_s2 = inlined_call_operand.vmem [shape: f32[1,128], index: 2, kind: input, shape index: {}]   ;;  %s579_s3 = inlined_call_operand.vmem [shape: bf16[128,128], index: 3, kind: input, shape index: {}]   ;;  %s580_s4 = inlined_call_operand.vmem [shape: f32[1,128], index: 4, kind: input, shape index: {}]   ;;  %s581_s5 = inlined_call_operand.vmem [shape: bf16[128,8], index: 5, kind: input, shape index: {}]   ;;  %s582_s6 = inlined_call_operand.vmem [shape: f32[1,8], index: 6, kind: input, shape index: {}]   ;;  %s583_s7 = inlined_call_operand.hbm [shape: f32[4,8], index: 7, kind: output, shape index: {}]  }
   0x1   :  { %v28_v0 = vld [vmem:[%s576_s0] sm:$0xf]  ;;  %393 = vset.pattern.permute.xlu0 %v437_v1  ;;  %395 = vset.pattern.permute.xlu1 %v438_v2  ;;  %v398_v5 = vld [vmem:[%s579_s3 + $0x8] sm:$0xff]   ;;  %v399_v7 = vld [vmem:[%s579_s3 + $0x10] sm:$0xff]   ;;  %vm441_vm0 = vmmov 0  }
   0x2   :  { %v397_v3 = vld [vmem:[%s579_s3] sm:$0xff]   ;;  %32 = vperm.xlu0 %393, %v28_v0   ;;  %51 = vperm.xlu1 %395, %v28_v0   ;;  %v400_v8 = vld [vmem:[%s579_s3 + $0x18] sm:$0xff]  }
   0x3   :  { %347 = vmatprep.subr.bf16.mxu0 %v439_v4  ;;  %367 = vmatprep.subr.bf16.mxu1 %v439_v4 }
   0x4   :  { %348 = vmatpush3.bf16.msra.mxu0 %v397_v3  ;;  %363 = vmatprep.mubr.msk.bf16.mxu0 %vm441_vm0, %v439_v4 }
   0x5   :  { %349 = vmatprep.subr.bf16.mxu0 %v439_v4  ;;  %383 = vmatprep.mubr.msk.bf16.mxu1 %vm441_vm0, %v439_v4 }
   0x6   :  { %394 = vset.pattern.permute.xlu0 %v440_v6 }
   0x7   :  { %41 = vperm.xlu0 %394, %v28_v0  }
   0x8   :  { %350 = vmatpush3.bf16.msra.mxu0 %v398_v5 }
   0x9   :  { %351 = vmatprep.subr.bf16.mxu0 %v439_v4 }
   0xb   :  { %396 = vset.pattern.permute.xlu0 %v438_v2 }
   0xc   :  { %352 = vmatpush3.bf16.msra.mxu0 %v399_v7 }
   0xd   :  { %353 = vmatprep.subr.bf16.mxu0 %v439_v4 }
   0xe   :  { %12 = vsyncpa [#allocation3], 0  ;;  %v401_v9 = vld [vmem:[%s579_s3 + $0x20] sm:$0xff]   ;;  %v402_v11 = vld [vmem:[%s579_s3 + $0x28] sm:$0xff]   ;;  %v35_v19 = vlaneseq  ;;  %s442_s15 = smov [#allocation2]   ;;  %vm294_vm1 = vcmask 60416  }
   0xf   :  { %v405_v10 = vld [vmem:[%s581_s5] sm:$0xff]   ;;  %v406_v12 = vld [vmem:[%s581_s5 + $0x8] sm:$0xff]   ;;  %v403_v13 = vld [vmem:[%s579_s3 + $0x30] sm:$0xff]   ;;  %s302_s16 = sshll.u32 %s442_s15, 4  ;;  %s303_s16 = int_to_ptr.vmem [resolvable:$true] %s302_s16 }
  0x10   :  { %354 = vmatpush3.bf16.msra.mxu0 %v400_v8  ;;  %368 = vmatpush3.bf16.msra.mxu1 %v405_v10  ;;  %v407_v14 = vld [vmem:[%s581_s5 + $0x10] sm:$0xff]   ;;  %v404_v15 = vld [vmem:[%s579_s3 + $0x38] sm:$0xff]   ;;  %v409_v17 = vld [vmem:[%s581_s5 + $0x20] sm:$0xff]   ;;  %v36_v20 = vshrl.u32 %v35_v19, 7  ;;  %p418_p1 = scmp.lt.s32.totalorder %s303_s16, %s303_s16 }
  0x11   :  { %355 = vmatprep.subr.bf16.mxu0 %v439_v4  ;;  %369 = vmatprep.subr.bf16.mxu1 %v439_v4  ;;  %v408_v16 = vld [vmem:[%s581_s5 + $0x18] sm:$0xff]   ;;  %v410_v18 = vld [vmem:[%s581_s5 + $0x28] sm:$0xff]   ;;  %v29_v24 = vld [vmem:[%s577_s1] sm:$0x7] }
  0x12   :  { %v37_v21 = vsub.s32 0, %v36_v20  ;;  %v46_v22 = vsub.s32 1, %v36_v20  ;;  %v56_v23 = vsub.s32 2, %v36_v20  ;;  %v310_v35 = vld [vmem:[%s578_s2] ss:$0 sm:$0xff]  ;;  %v411_v40 = vld [vmem:[%s581_s5 + $0x30] sm:$0xff]  }
  0x13   :  { %v412_v41 = vld [vmem:[%s581_s5 + $0x38] sm:$0xff]   ;;  %v311_v42 = vld [vmem:[%s580_s4] ss:$0 sm:$0xff]  ;;  %s413_s4 = scalar_lea.vmem %s303_s16, 64 }
  0x14   :  { %356 = vmatpush3.bf16.msra.mxu0 %v401_v9  ;;  %370 = vmatpush3.bf16.msra.mxu1 %v406_v12  ;;  %v38_v26 = vrot.slane %v29_v24, %v37_v21  ;;  %v47_v27 = vrot.slane %v29_v24, %v46_v22  ;;  %v57_v28 = vrot.slane %v29_v24, %v56_v23  ;;  %v320_v50 = vld [vmem:[%s582_s6] ss:$0 sm:$0xff]  ;;  %p414_p0 = scmp.ne.s32.totalorder %s303_s16, %s413_s4  ;;  %p419_p2 = scmp.lt.s32.totalorder %s413_s4, %s413_s4 }
  0x15   :  { %357 = vmatprep.subr.bf16.mxu0 %v439_v4  ;;  %371 = vmatprep.subr.bf16.mxu1 %v439_v4 }
  0x16   :  { %p420_p3 = por %p419_p2, %p418_p1 }
  0x18   :  { %358 = vmatpush3.bf16.msra.mxu0 %v402_v11  ;;  %372 = vmatpush3.bf16.msra.mxu1 %v407_v14  ;;  %p421_p4 = pnand %p420_p3, %p414_p0 }
  0x19   :  { %359 = vmatprep.subr.bf16.mxu0 %v439_v4  ;;  %373 = vmatprep.subr.bf16.mxu1 %v439_v4 }
  0x1c   :  { %360 = vmatpush3.bf16.msra.mxu0 %v403_v13  ;;  %374 = vmatpush3.bf16.msra.mxu1 %v408_v16 }
  0x1d   :  { %361 = vmatprep.subr.bf16.mxu0 %v439_v4  ;;  %375 = vmatprep.subr.bf16.mxu1 %v439_v4 }
  0x20   :  { %362 = vmatpush3.bf16.msra.mxu0 %v404_v15  ;;  %376 = vmatpush3.bf16.msra.mxu1 %v409_v17 }
  0x21   :  { %377 = vmatprep.subr.bf16.mxu1 %v439_v4 }
  0x24   :  { %378 = vmatpush3.bf16.msra.mxu1 %v410_v18 }
  0x25   :  { %379 = vmatprep.subr.bf16.mxu1 %v439_v4 }
  0x28   :  { %380 = vmatpush3.bf16.msra.mxu1 %v411_v40 }
  0x29   :  { %381 = vmatprep.subr.bf16.mxu1 %v439_v4 }
  0x2c   :  { %382 = vmatpush3.bf16.msra.mxu1 %v412_v41 }
  0x81   :  { %v33_v25 = vpop.permute.xlu0 %32  ;;  %v52_v29 = vpop.permute.xlu1 %51 }
  0x82   :  { %v39_v31 = vmul.f32 %v38_v26, %v33_v25  ;;  %v58_v33 = vmul.f32 %v57_v28, %v52_v29 }
  0x86   :  { %v42_v30 = vpop.permute.xlu0 %41 }
  0x87   :  { %v48_v32 = vmul.f32 %v47_v27, %v42_v30 }
  0x89   :  { %v49_v34 = vadd.f32 %v48_v32, %v39_v31 }
  0x8b   :  { %v59_v36 = vadd.f32 %v58_v33, %v49_v34 }
  0x8d   :  { %v67_v37 = vadd.f32 %v310_v35, %v59_v36 }
  0x8f   :  { %v68_v38 = vmax.f32 %v67_v37, 0.0 }
  0x91   :  { %v69_v39 = vpack.c.bf16 %v68_v38, %v68_v38 }
  0x93   :  { %364 = vmatmul.mubr.bf16.vlgmr.msra.gmra.mrb[0].mxu0 %v69_v39 }
 0x166   :  { %v175_v43 = vpop.f32.mrb[0].mxu0 }
 0x167   :  { %v176_v44 = vadd.f32 %v311_v42, %v175_v43  ;;  %v365_v45 = vpop.f32.mrb[1].mxu0 }
 0x168   :  { %v178_v46 = vpop.f32.mrb[2].mxu0 }
 0x169   :  { %v181_v47 = vmax.f32 %v176_v44, 0.0  ;;  %v366_v48 = vpop.f32.mrb[3].mxu0 }
 0x16b   :  { %v182_v49 = vpack.c.bf16 %v181_v47, %v181_v47 }
 0x16d   :  { %384 = vmatmul.mubr.bf16.vlgmr.msra.gmra.mrb[0].mxu1 %v182_v49 }
 0x240   :  { %v288_v51 = vpop.f32.mrb[0].mxu1 }
 0x241   :  { %v289_v52 = vadd.f32 %v320_v50, %v288_v51  ;;  %v385_v53 = vpop.f32.mrb[1].mxu1 }
 0x242   :  { %v291_v54 = vpop.f32.mrb[2].mxu1 }
 0x243   :  { %v386_v55 = vpop.f32.mrb[3].mxu1  ;;  %295 = vst.msk [vmem:[#allocation2] sm:$0xf] %vm294_vm1, %v289_v52 }
 0x244   :  { %424 = shalt.err (!%p421_p4)
}
 0x245   :  { %s425_s6 = scalar_lea.hbm %s583_s7, 64 }
 0x246   :  { %p426_p5 = scmp.ne.s32.totalorder %s583_s7, %s425_s6  ;;  %p429_p6 = scmp.lt.u32.totalorder %s425_s6, %s583_s7 }
 0x248   :  { %p431_p7 = pnand %p429_p6, %p426_p5 }
 0x24a   :  { %434 = shalt.err (!%p431_p7)
}
 0x24b   :  { %305 = dma.vmem_to_hbm [thread:$0]  %s303_s16, 64, %s583_s7, [#allocation3]  }
 0x24c   :  { %435 = dma.done.wait [#allocation3], 64  }
 0x24d   :  { %436 = vsyncadd [#allocation3], 4294967232 }
 0x24e   :  { %309 = vsyncpa [#allocation3], 1 }

</bundles_post_ra>
